<compile_context>
chip_gen: v5e
topology: v5e:2x2
jax: 0.10.0
libtpu: 0.0.40
codegen_flags: <defaults>
</compile_context>

<pallas_src>
import jax
import jax.numpy as jnp
from jax.experimental import pallas as pl
from jax.experimental.pallas import tpu as pltpu


def _threshold_kernel(x_ref, o_ref):
    # Pure VPU elementwise hot path: (x > 0.5) -> int32 (matches torch .int()).
    o_ref[...] = (x_ref[...] > 0.5).astype(jnp.int32)


# Widest lane-dense width (multiple of 128) we try for the slab's last dim.
_LANE_WIDTHS = (4096, 2048, 1024, 512, 256, 128)

_OUT_ITEMSIZE = 4  # int32 output (torch .int() contract)

# Total double-buffered VMEM budget for (input block + output block) x 2.
# 12 MiB keeps us under v5e's 16 MiB default scoped-VMEM limit with headroom,
# and is comfortably inside v6e/v7x limits.
_DOUBLE_BUFFERED_VMEM_BUDGET = 12 * 1024 * 1024

# Below this input size, XLA's fused compare+cast beats pallas_call launch +
# pipeline fill/drain cost.
_BYPASS_BYTES = 2 * 1024 * 1024

# Keep at least this many blocks for large inputs so the pipeline has depth
# and both v7x TensorCores get multiple steps each.
_MIN_GRID = 8


def _inline(x: jax.Array) -> jax.Array:
    return (x > 0.5).astype(jnp.int32)


def predict(x: jax.Array) -> jax.Array:
    """Pallas equivalent of Predict.forward: (x > 0.5).int()."""
    orig_shape = x.shape
    total = x.size
    in_itemsize = jnp.dtype(x.dtype).itemsize

    # Small-input bypass: launch + fill/drain overhead dominates the roofline
    # for tiny tensors, and XLA fuses this trivially with neighbors.
    if total * in_itemsize < _BYPASS_BYTES:
        return _inline(x)

    # Pick the widest lane width that divides the element count exactly so the
    # reshape is free (no jnp.pad / output slice => no extra HBM passes).
    lane = next((w for w in _LANE_WIDTHS if total % w == 0), None)
    if lane is None:
        # Ragged total (not a multiple of 128): XLA fusion already hits the
        # HBM roofline for this trivial elementwise op, so just do it inline.
        return _inline(x)

    rows = total // lane
    x2d = x.reshape(rows, lane)  # free row-major reshape

    # Sublane packing multiple: 8 for 32-bit, 16 for 16-bit, 32 for 8-bit input.
    sublane_mult = max(8, 32 // max(1, in_itemsize))

    per_elem_block_bytes = lane * (in_itemsize + _OUT_ITEMSIZE)
    # Per-block budget (in + out), leaving room for double buffering.
    budget_rows = max(1, (_DOUBLE_BUFFERED_VMEM_BUDGET // 2) // per_elem_block_bytes)
    # Cap so that large inputs still produce >= _MIN_GRID blocks.
    target_rows = pl.cdiv(rows, _MIN_GRID)

    if rows < sublane_mult:
        block_rows = rows  # full-extent block is allowed for short slabs
    else:
        block_rows = min(rows, budget_rows, target_rows)
        block_rows = max(sublane_mult, (block_rows // sublane_mult) * sublane_mult)

    grid_len = pl.cdiv(rows, block_rows)
    if grid_len < 4:
        # Too few blocks to amortize launch + pipeline fill/drain; let XLA fuse.
        return _inline(x)

    # Explicit scoped-VMEM budget: 2x(in_block + out_block) + headroom.
    block_bytes = block_rows * per_elem_block_bytes
    vmem_limit = min(64 * 1024 * 1024, 2 * block_bytes + (2 * 1024 * 1024))

    cost = pl.CostEstimate(
        flops=total,
        transcendentals=0,
        bytes_accessed=total * (in_itemsize + _OUT_ITEMSIZE),
    )

    out2d = pl.pallas_call(
        _threshold_kernel,
        out_shape=jax.ShapeDtypeStruct((rows, lane), jnp.int32),
        grid=(grid_len,),
        in_specs=[pl.BlockSpec((block_rows, lane), lambda i: (i, 0))],
        out_specs=pl.BlockSpec((block_rows, lane), lambda i: (i, 0)),
        compiler_params=pltpu.CompilerParams(
            # Single independent axis: software-pipelined DMA/compute overlap;
            # on v7x this axis may be sharded across both TensorCores.
            dimension_semantics=("parallel",),
            vmem_limit_bytes=vmem_limit,
        ),
        cost_estimate=cost,
    )(x2d)

    return out2d.reshape(orig_shape)


if __name__ == "__main__":
    key = jax.random.PRNGKey(0)

    # Small NCHW input (bypass path) consistent with a typical image batch.
    x = jax.random.uniform(key, (2, 4, 16, 16), dtype=jnp.float32)
    out = predict(x)
    jax.block_until_ready(out)
    ref = (x > 0.5).astype(jnp.int32)
    assert out.shape == ref.shape
    assert out.dtype == jnp.int32
    assert bool(jnp.all(out == ref))

    # Larger input to exercise the multi-block, pipelined Pallas path (grid >= 8).
    x_big = jax.random.uniform(
        jax.random.PRNGKey(1), (16, 16, 64, 64), dtype=jnp.float32
    )
    out_big = predict(x_big)
    jax.block_until_ready(out_big)
    ref_big = (x_big > 0.5).astype(jnp.int32)
    assert out_big.shape == ref_big.shape
    assert out_big.dtype == jnp.int32
    assert bool(jnp.all(out_big == ref_big))

    # Ragged block count: rows % block_rows != 0 -> partial (masked) last block.
    x_rag = jax.random.uniform(
        jax.random.PRNGKey(2), (11, 13, 64, 64), dtype=jnp.float32
    )
    out_rag = predict(x_rag)
    jax.block_until_ready(out_rag)
    ref_rag = (x_rag > 0.5).astype(jnp.int32)
    assert out_rag.shape == ref_rag.shape
    assert out_rag.dtype == jnp.int32
    assert bool(jnp.all(out_rag == ref_rag))

    print("KERNEL_OK")
</pallas_src>

<mosaic_0001>
module attributes {stable_mosaic.version = 11 : i64} {
  func.func @_threshold_kernel(%arg0: i32, %arg1: memref<32x4096xf32, #tpu.memory_space<vmem>>, %arg2: memref<32x4096xi32, #tpu.memory_space<vmem>>) attributes {dimension_semantics = [#tpu.dimension_semantics<parallel>], iteration_bounds = array<i64: 8>, scalar_prefetch = 0 : i64, scratch_operands = 0 : i64, tpu.core_type = #tpu.core_type<tc>, window_params = [{transform_indices = @transform_0, window_bounds = array<i64: 32, 4096>}, {transform_indices = @transform_1, window_bounds = array<i64: 32, 4096>}]} {
    %c0 = arith.constant 0 : index
    %c0_0 = arith.constant 0 : index
    %0 = vector.load %arg1[%c0, %c0_0] : memref<32x4096xf32, #tpu.memory_space<vmem>>, vector<32x4096xf32>
    %cst = arith.constant 5.000000e-01 : f32
    %1 = vector.broadcast %cst : f32 to vector<32x4096xf32>
    %2 = arith.cmpf ogt, %0, %1 : vector<32x4096xf32>
    %3 = arith.extui %2 : vector<32x4096xi1> to vector<32x4096xi32>
    %c0_1 = arith.constant 0 : index
    %c0_2 = arith.constant 0 : index
    %4 = vector.load %arg2[%c0_1, %c0_2] : memref<32x4096xi32, #tpu.memory_space<vmem>>, vector<32x4096xi32>
    tpu.vector_store %arg2[%c0_1, %c0_2], %3 {strides = array<i32>} : memref<32x4096xi32, #tpu.memory_space<vmem>>, vector<32x4096xi32>,
    return
  }
  func.func @transform_0(%arg0: i32) -> (i32, i32) {
    %c0_i32 = arith.constant 0 : i32
    %c0_i32_0 = arith.constant 0 : i32
    return %arg0, %c0_i32 : i32, i32
  }
  func.func @transform_1(%arg0: i32) -> (i32, i32) {
    %c0_i32 = arith.constant 0 : i32
    %c0_i32_0 = arith.constant 0 : i32
    return %arg0, %c0_i32 : i32, i32
  }
}

</mosaic_0001>

<bundles_post_ra>
// kernel: tpu_custom_call.1
= control target key start
LH: loop header
LB: loop body
LE: loop exit
PB: predicated region body
PF: predicated region fallthrough
CT: control target
= control target key end

     0   :  { %6 = vsyncpa [#allocation3], 0  ;;  %s1440_s0 = inlined_call_operand.hbm [shape: f32[256,4096], index: 0, kind: input, shape index: {}]   ;;  %s1441_s1 = inlined_call_operand.hbm [shape: s32[256,4096], index: 1, kind: output, shape index: {}]  }
   0x1   :  { %8 = vsyncpa [#allocation3 + $0x1], 0 }
   0x2   :  { %9 = vsyncpa [#allocation4], 0 }
   0x3   :  { %11 = vsyncpa [#allocation4 + $0x1], 0  ;;  %s926_s6 = smov 0   ;;  %s928_s7 = smov 0  }
   0x4   :  { %s930_s8 = smov 0   ;;  %s932_s9 = smov 0  }
   0x5 LB: > { %s947_s10 = sadd.s32 4294967295, %s909_s9   ;;  %s742_s11 = sadd.s32 4294967294, %s909_s9   ;;  %s909_s9 = sphi %s932_s9, %s1450_s9   ;;  %s905_s8 = sphi %s930_s8, %s1449_s8   ;;  %s901_s7 = sphi %s928_s7, %s1448_s7   ;;  %s897_s6 = sphi %s926_s6, %s1447_s6  }
   0x6   : > { %s951_s12 = sadd.s32 1, %s909_s9   ;;  %s24_s13 = sadd.s32 1, %s905_s8 }
   0x7   : > { %s21_s14 = ssub.s32 %s909_s9, %s951_s12  ;;  %p31_p0 = scmp.ne.s32.totalorder %s905_s8, %s901_s7 }
   0x8   : > { %p22_p1 = scmp.eq.s32.totalorder %s21_s14, 0  ;;  %p32_p2 = scmp.eq.s32.totalorder %s909_s9, 0 }
   0x9   : > { %p37_p3 = scmp.ne.s32.totalorder %s901_s7, %s897_s6  ;;  %p38_p4 = scmp.eq.s32.totalorder %s947_s10, 0 }
   0xa   : > { %s963_s15 = scalar_select %p22_p1, %s905_s8, %s24_s13  }
   0xb   : > { %p965_p5 = por %p32_p2, %p31_p0  ;;  %p969_p6 = por %p38_p4, %p37_p3 }
   0xc   : > { %p61_p7 = scmp.eq.s32.totalorder %s947_s10, 7  ;;  %p67_p8 = scmp.eq.s32.totalorder %s742_s11, 7 }
   0xd   : > { %p774_p9 = scmp.lt.s32.totalorder %s909_s9, 8  ;;  %s87_s20 = sand.u32 1, %s905_s8  }
   0xe   : > { %p975_p10 = por %p61_p7, %p31_p0  ;;  %p979_p11 = por %p67_p8, %p37_p3 }
   0xf   : > { %s759_s21 = sshll.u32 %s909_s9, 10  ;;  %s745_s22 = sshll.u32 %s87_s20, 10 }
  0x10   : > { %s97_s25 = scalar_lea.hbm %s1440_s0, %s759_s21  ;;  %s91_s27 = scalar_lea.vmem [#allocation2], %s745_s22 }
  0x11   : > { %s98_s26 = sshll.u32 %s97_s25, 4  ;;  %s100_s28 = sshll.u32 %s91_s27, 4  ;;  %s99_s26 = int_to_ptr.hbm [resolvable:$true] %s98_s26  ;;  %s101_s28 = int_to_ptr.vmem [resolvable:$true] %s100_s28 }
  0x12   : > { %p990_p12 = pnand %p774_p9, %p965_p5  ;;  %p749_p13 = scmp.ge.s32.totalorder %s909_s9, 1 }
  0x13   : > { %p108_p0 = scmp.lt.s32.totalorder %s909_s9, 9  ;;  %s88_s30 = scalar_lea.sflag [#allocation3], %s87_s20 }
  0x14   : > { %s813_s2 = sshra.s32 %s99_s26, 4  ;;  %p817_p2 = pneg %p990_p12  ;;  %s814_s2 = int_to_ptr.hbm [resolvable:$true] %s813_s2 }
  0x15   : > { %s815_s3 = scalar_lea.hbm %s814_s2, 1024  ;;  %s820_s11 = scalar_lea.hbm %s1440_s0, 8192 }
  0x16   : > { %p816_p1 = scmp.ne.s32.totalorder %s814_s2, %s815_s3  ;;  %p821_p5 = scmp.lt.s32.totalorder %s814_s2, %s1440_s0 }
  0x17   : > { %p822_p7 = scmp.lt.s32.totalorder %s820_s11, %s815_s3 }
  0x18   : > { %p818_p3 = pnand %p817_p2, %p816_p1 }
  0x19   : > { %p823_p8 = por %p822_p7, %p821_p5 }
  0x1a   : > { %p819_p4 = pneg %p818_p3 }
  0x1c   : > { %p824_p9 = pnand %p823_p8, %p819_p4 }
  0x1e   : > { %827 = shalt.err (!%p824_p9)
}
  0x1f   : > { %s911_s16 = smov 4096   ;;  %s912_s20 = smov 256  }
  0x20   : > { %769 = dma.hbm_to_vmem [thread:$0]  (!%p990_p12), %s99_s26, 16384, %s101_s28, %s88_s30, %s911_s16, %s911_s16, %s912_s20  }
  0x21   : > { %p109_p1 = pnand %p749_p13, %p108_p0 }
  0x22   : > { %s1011_s21 = sand.u32 (!%p109_p1), 1, %s901_s7  }
  0x23   : > { %112 = sbr.rel (%p109_p1) target bundleno = 175 (0xaf), region = 24  ;;  %s750_s22 = sshll.u32 (!%p109_p1), %s1011_s21, 10 }
  0x24   : > { %s115_s23 = scalar_lea.sflag (!%p109_p1), [#allocation3], %s1011_s21  ;;  %s1015_s24 = scalar_lea.vmem (!%p109_p1), [#allocation2], %s750_s22 }
  0x28   : > { %888 = dma.done.wait (%p969_p6), %s115_s23, 16384  }
  0x29   : > { %890 = vsyncadd (%p969_p6), %s115_s23, 4294950912  ;;  %v140_v0 = vld [vmem:[%s1015_s24] sm:$0xff]  ;;  %v141_v1 = vld [vmem:[%s1015_s24 + $0x8] sm:$0xff]  ;;  %v913_v6 = vmov 0   ;;  %s1032_s17 = scalar_lea.vmem [#allocation5], %s750_s22  ;;  %s761_s25 = sshll.u32 %s947_s10, 10 }
  0x2a   : > { %v142_v2 = vld [vmem:[%s1015_s24 + $0x10] sm:$0xff]  ;;  %vm268_vm0 = vcmp.gt.f32.partialorder %v140_v0, 0.5  ;;  %vm269_vm1 = vcmp.gt.f32.partialorder %v141_v1, 0.5  ;;  %v143_v3 = vld [vmem:[%s1015_s24 + $0x18] sm:$0xff]  ;;  %v144_v4 = vld [vmem:[%s1015_s24 + $0x20] sm:$0xff]  ;;  %s665_s27 = scalar_lea.hbm %s1441_s1, %s761_s25  ;;  %s666_s28 = sshll.u32 %s1032_s17, 4  ;;  %s667_s28 = int_to_ptr.vmem [resolvable:$true] %s666_s28 }
  0x2b   : > { %vm270_vm2 = vcmp.gt.f32.partialorder %v142_v2, 0.5  ;;  %v145_v5 = vld [vmem:[%s1015_s24 + $0x28] sm:$0xff]  ;;  %v396_v7 = vsel %vm268_vm0, 1, %v913_v6  ;;  %v397_v8 = vsel %vm269_vm1, 1, %v913_v6  ;;  %vm271_vm3 = vcmp.gt.f32.partialorder %v143_v3, 0.5  ;;  %v146_v10 = vld [vmem:[%s1015_s24 + $0x30] sm:$0xff] }
  0x2c   : > { %v398_v9 = vsel %vm270_vm2, 1, %v913_v6  ;;  %v147_v11 = vld [vmem:[%s1015_s24 + $0x38] sm:$0xff]  ;;  %524 = vst [vmem:[%s1032_s17] sm:$0xff] %v396_v7  ;;  %v399_v12 = vsel %vm271_vm3, 1, %v913_v6  ;;  %vm272_vm4 = vcmp.gt.f32.partialorder %v144_v4, 0.5  ;;  %vm273_vm5 = vcmp.gt.f32.partialorder %v145_v5, 0.5  ;;  %v148_v13 = vld [vmem:[%s1015_s24 + $0x40] sm:$0xff] }
  0x2d   : > { %vm274_vm6 = vcmp.gt.f32.partialorder %v146_v10, 0.5  ;;  %v149_v14 = vld [vmem:[%s1015_s24 + $0x48] sm:$0xff]  ;;  %525 = vst [vmem:[%s1032_s17 + $0x8] sm:$0xff] %v397_v8  ;;  %v400_v15 = vsel %vm272_vm4, 1, %v913_v6  ;;  %vm275_vm7 = vcmp.gt.f32.partialorder %v147_v11, 0.5  ;;  %v150_v16 = vld [vmem:[%s1015_s24 + $0x50] sm:$0xff] }
  0x2e   : > { %526 = vst [vmem:[%s1032_s17 + $0x10] sm:$0xff] %v398_v9  ;;  %v401_v17 = vsel %vm273_vm5, 1, %v913_v6  ;;  %vm276_vm8 = vcmp.gt.f32.partialorder %v148_v13, 0.5  ;;  %v151_v18 = vld [vmem:[%s1015_s24 + $0x58] sm:$0xff]  ;;  %v402_v19 = vsel %vm274_vm6, 1, %v913_v6  ;;  %vm277_vm9 = vcmp.gt.f32.partialorder %v149_v14, 0.5 }
  0x2f   : > { %527 = vst [vmem:[%s1032_s17 + $0x18] sm:$0xff] %v399_v12  ;;  %v152_v20 = vld [vmem:[%s1015_s24 + $0x60] sm:$0xff]  ;;  %v403_v21 = vsel %vm275_vm7, 1, %v913_v6  ;;  %vm278_vm10 = vcmp.gt.f32.partialorder %v150_v16, 0.5  ;;  %v153_v22 = vld [vmem:[%s1015_s24 + $0x68] sm:$0xff]  ;;  %v404_v23 = vsel %vm276_vm8, 1, %v913_v6 }
  0x30   : > { %528 = vst [vmem:[%s1032_s17 + $0x20] sm:$0xff] %v400_v15  ;;  %vm279_vm11 = vcmp.gt.f32.partialorder %v151_v18, 0.5  ;;  %v154_v24 = vld [vmem:[%s1015_s24 + $0x70] sm:$0xff]  ;;  %v405_v25 = vsel %vm277_vm9, 1, %v913_v6  ;;  %vm280_vm12 = vcmp.gt.f32.partialorder %v152_v20, 0.5  ;;  %v155_v26 = vld [vmem:[%s1015_s24 + $0x78] sm:$0xff] }
  0x31   : > { %529 = vst [vmem:[%s1032_s17 + $0x28] sm:$0xff] %v401_v17  ;;  %v406_v27 = vsel %vm278_vm10, 1, %v913_v6  ;;  %vm281_vm13 = vcmp.gt.f32.partialorder %v153_v22, 0.5  ;;  %v156_v28 = vld [vmem:[%s1015_s24 + $0x80] sm:$0xff]  ;;  %v407_v29 = vsel %vm279_vm11, 1, %v913_v6  ;;  %vm282_vm14 = vcmp.gt.f32.partialorder %v154_v24, 0.5 }
  0x32   : > { %530 = vst [vmem:[%s1032_s17 + $0x30] sm:$0xff] %v402_v19  ;;  %v157_v30 = vld [vmem:[%s1015_s24 + $0x88] sm:$0xff]  ;;  %v408_v31 = vsel %vm280_vm12, 1, %v913_v6  ;;  %vm283_vm15 = vcmp.gt.f32.partialorder %v155_v26, 0.5  ;;  %v158_v32 = vld [vmem:[%s1015_s24 + $0x90] sm:$0xff]  ;;  %v409_v33 = vsel %vm281_vm13, 1, %v913_v6 }
  0x33   : > { %531 = vst [vmem:[%s1032_s17 + $0x38] sm:$0xff] %v403_v21  ;;  %vm284_vm0 = vcmp.gt.f32.partialorder %v156_v28, 0.5  ;;  %v159_v34 = vld [vmem:[%s1015_s24 + $0x98] sm:$0xff]  ;;  %v410_v35 = vsel %vm282_vm14, 1, %v913_v6  ;;  %vm285_vm1 = vcmp.gt.f32.partialorder %v157_v30, 0.5  ;;  %v160_v36 = vld [vmem:[%s1015_s24 + $0xa0] sm:$0xff] }
  0x34   : > { %532 = vst [vmem:[%s1032_s17 + $0x40] sm:$0xff] %v404_v23  ;;  %v411_v37 = vsel %vm283_vm15, 1, %v913_v6  ;;  %vm286_vm2 = vcmp.gt.f32.partialorder %v158_v32, 0.5  ;;  %v161_v38 = vld [vmem:[%s1015_s24 + $0xa8] sm:$0xff]  ;;  %v412_v39 = vsel %vm284_vm0, 1, %v913_v6  ;;  %vm287_vm3 = vcmp.gt.f32.partialorder %v159_v34, 0.5 }
  0x35   : > { %533 = vst [vmem:[%s1032_s17 + $0x48] sm:$0xff] %v405_v25  ;;  %v162_v40 = vld [vmem:[%s1015_s24 + $0xb0] sm:$0xff]  ;;  %v413_v41 = vsel %vm285_vm1, 1, %v913_v6  ;;  %vm288_vm4 = vcmp.gt.f32.partialorder %v160_v36, 0.5  ;;  %v163_v42 = vld [vmem:[%s1015_s24 + $0xb8] sm:$0xff]  ;;  %v414_v43 = vsel %vm286_vm2, 1, %v913_v6 }
  0x36   : > { %534 = vst [vmem:[%s1032_s17 + $0x50] sm:$0xff] %v406_v27  ;;  %vm289_vm5 = vcmp.gt.f32.partialorder %v161_v38, 0.5  ;;  %v164_v44 = vld [vmem:[%s1015_s24 + $0xc0] sm:$0xff]  ;;  %v415_v45 = vsel %vm287_vm3, 1, %v913_v6  ;;  %vm290_vm6 = vcmp.gt.f32.partialorder %v162_v40, 0.5  ;;  %v165_v46 = vld [vmem:[%s1015_s24 + $0xc8] sm:$0xff] }
  0x37   : > { %535 = vst [vmem:[%s1032_s17 + $0x58] sm:$0xff] %v407_v29  ;;  %v416_v47 = vsel %vm288_vm4, 1, %v913_v6  ;;  %vm291_vm7 = vcmp.gt.f32.partialorder %v163_v42, 0.5  ;;  %v166_v48 = vld [vmem:[%s1015_s24 + $0xd0] sm:$0xff]  ;;  %v417_v49 = vsel %vm289_vm5, 1, %v913_v6  ;;  %vm292_vm8 = vcmp.gt.f32.partialorder %v164_v44, 0.5 }
  0x38   : > { %536 = vst [vmem:[%s1032_s17 + $0x60] sm:$0xff] %v408_v31  ;;  %v167_v50 = vld [vmem:[%s1015_s24 + $0xd8] sm:$0xff]  ;;  %v418_v51 = vsel %vm290_vm6, 1, %v913_v6  ;;  %vm293_vm9 = vcmp.gt.f32.partialorder %v165_v46, 0.5  ;;  %v168_v52 = vld [vmem:[%s1015_s24 + $0xe0] sm:$0xff]  ;;  %v419_v53 = vsel %vm291_vm7, 1, %v913_v6 }
  0x39   : > { %537 = vst [vmem:[%s1032_s17 + $0x68] sm:$0xff] %v409_v33  ;;  %vm294_vm10 = vcmp.gt.f32.partialorder %v166_v48, 0.5  ;;  %v169_v54 = vld [vmem:[%s1015_s24 + $0xe8] sm:$0xff]  ;;  %v420_v55 = vsel %vm292_vm8, 1, %v913_v6  ;;  %vm295_vm11 = vcmp.gt.f32.partialorder %v167_v50, 0.5  ;;  %v170_v56 = vld [vmem:[%s1015_s24 + $0xf0] sm:$0xff] }
  0x3a   : > { %538 = vst [vmem:[%s1032_s17 + $0x70] sm:$0xff] %v410_v35  ;;  %v421_v57 = vsel %vm293_vm9, 1, %v913_v6  ;;  %vm296_vm12 = vcmp.gt.f32.partialorder %v168_v52, 0.5  ;;  %v171_v58 = vld [vmem:[%s1015_s24 + $0xf8] sm:$0xff]  ;;  %v422_v59 = vsel %vm294_vm10, 1, %v913_v6  ;;  %vm297_vm13 = vcmp.gt.f32.partialorder %v169_v54, 0.5 }
  0x3b   : > { %539 = vst [vmem:[%s1032_s17 + $0x78] sm:$0xff] %v411_v37  ;;  %v172_v60 = vld [vmem:[%s1015_s24 + $0x100] sm:$0xff]  ;;  %v423_v61 = vsel %vm295_vm11, 1, %v913_v6  ;;  %vm298_vm14 = vcmp.gt.f32.partialorder %v170_v56, 0.5  ;;  %v173_v62 = vld [vmem:[%s1015_s24 + $0x108] sm:$0xff]  ;;  %v424_v63 = vsel %vm296_vm12, 1, %v913_v6 }
  0x3c   : > { %540 = vst [vmem:[%s1032_s17 + $0x80] sm:$0xff] %v412_v39  ;;  %vm299_vm15 = vcmp.gt.f32.partialorder %v171_v58, 0.5  ;;  %v174_v0 = vld [vmem:[%s1015_s24 + $0x110] sm:$0xff]  ;;  %v425_v1 = vsel %vm297_vm13, 1, %v913_v6  ;;  %vm300_vm0 = vcmp.gt.f32.partialorder %v172_v60, 0.5  ;;  %v175_v2 = vld [vmem:[%s1015_s24 + $0x118] sm:$0xff] }
  0x3d   : > { %541 = vst [vmem:[%s1032_s17 + $0x88] sm:$0xff] %v413_v41  ;;  %v426_v3 = vsel %vm298_vm14, 1, %v913_v6  ;;  %vm301_vm1 = vcmp.gt.f32.partialorder %v173_v62, 0.5  ;;  %v176_v4 = vld [vmem:[%s1015_s24 + $0x120] sm:$0xff]  ;;  %v427_v5 = vsel %vm299_vm15, 1, %v913_v6  ;;  %vm302_vm2 = vcmp.gt.f32.partialorder %v174_v0, 0.5 }
  0x3e   : > { %542 = vst [vmem:[%s1032_s17 + $0x90] sm:$0xff] %v414_v43  ;;  %v177_v7 = vld [vmem:[%s1015_s24 + $0x128] sm:$0xff]  ;;  %v428_v8 = vsel %vm300_vm0, 1, %v913_v6  ;;  %vm303_vm3 = vcmp.gt.f32.partialorder %v175_v2, 0.5  ;;  %v178_v9 = vld [vmem:[%s1015_s24 + $0x130] sm:$0xff]  ;;  %v429_v10 = vsel %vm301_vm1, 1, %v913_v6 }
  0x3f   : > { %543 = vst [vmem:[%s1032_s17 + $0x98] sm:$0xff] %v415_v45  ;;  %vm304_vm4 = vcmp.gt.f32.partialorder %v176_v4, 0.5  ;;  %v179_v11 = vld [vmem:[%s1015_s24 + $0x138] sm:$0xff]  ;;  %v430_v12 = vsel %vm302_vm2, 1, %v913_v6  ;;  %vm305_vm5 = vcmp.gt.f32.partialorder %v177_v7, 0.5  ;;  %v180_v13 = vld [vmem:[%s1015_s24 + $0x140] sm:$0xff] }
  0x40   : > { %544 = vst [vmem:[%s1032_s17 + $0xa0] sm:$0xff] %v416_v47  ;;  %v431_v14 = vsel %vm303_vm3, 1, %v913_v6  ;;  %vm306_vm6 = vcmp.gt.f32.partialorder %v178_v9, 0.5  ;;  %v181_v15 = vld [vmem:[%s1015_s24 + $0x148] sm:$0xff]  ;;  %v432_v16 = vsel %vm304_vm4, 1, %v913_v6  ;;  %vm307_vm7 = vcmp.gt.f32.partialorder %v179_v11, 0.5 }
  0x41   : > { %545 = vst [vmem:[%s1032_s17 + $0xa8] sm:$0xff] %v417_v49  ;;  %v182_v17 = vld [vmem:[%s1015_s24 + $0x150] sm:$0xff]  ;;  %v433_v18 = vsel %vm305_vm5, 1, %v913_v6  ;;  %vm308_vm8 = vcmp.gt.f32.partialorder %v180_v13, 0.5  ;;  %v183_v19 = vld [vmem:[%s1015_s24 + $0x158] sm:$0xff]  ;;  %v434_v20 = vsel %vm306_vm6, 1, %v913_v6 }
  0x42   : > { %546 = vst [vmem:[%s1032_s17 + $0xb0] sm:$0xff] %v418_v51  ;;  %vm309_vm9 = vcmp.gt.f32.partialorder %v181_v15, 0.5  ;;  %v184_v21 = vld [vmem:[%s1015_s24 + $0x160] sm:$0xff]  ;;  %v435_v22 = vsel %vm307_vm7, 1, %v913_v6  ;;  %vm310_vm10 = vcmp.gt.f32.partialorder %v182_v17, 0.5  ;;  %v185_v23 = vld [vmem:[%s1015_s24 + $0x168] sm:$0xff] }
  0x43   : > { %547 = vst [vmem:[%s1032_s17 + $0xb8] sm:$0xff] %v419_v53  ;;  %v436_v24 = vsel %vm308_vm8, 1, %v913_v6  ;;  %vm311_vm11 = vcmp.gt.f32.partialorder %v183_v19, 0.5  ;;  %v186_v25 = vld [vmem:[%s1015_s24 + $0x170] sm:$0xff]  ;;  %v437_v26 = vsel %vm309_vm9, 1, %v913_v6  ;;  %vm312_vm12 = vcmp.gt.f32.partialorder %v184_v21, 0.5 }
  0x44   : > { %548 = vst [vmem:[%s1032_s17 + $0xc0] sm:$0xff] %v420_v55  ;;  %v187_v27 = vld [vmem:[%s1015_s24 + $0x178] sm:$0xff]  ;;  %v438_v28 = vsel %vm310_vm10, 1, %v913_v6  ;;  %vm313_vm13 = vcmp.gt.f32.partialorder %v185_v23, 0.5  ;;  %v188_v29 = vld [vmem:[%s1015_s24 + $0x180] sm:$0xff]  ;;  %v439_v30 = vsel %vm311_vm11, 1, %v913_v6 }
  0x45   : > { %549 = vst [vmem:[%s1032_s17 + $0xc8] sm:$0xff] %v421_v57  ;;  %vm314_vm14 = vcmp.gt.f32.partialorder %v186_v25, 0.5  ;;  %v189_v31 = vld [vmem:[%s1015_s24 + $0x188] sm:$0xff]  ;;  %v440_v32 = vsel %vm312_vm12, 1, %v913_v6  ;;  %vm315_vm15 = vcmp.gt.f32.partialorder %v187_v27, 0.5  ;;  %v190_v33 = vld [vmem:[%s1015_s24 + $0x190] sm:$0xff] }
  0x46   : > { %550 = vst [vmem:[%s1032_s17 + $0xd0] sm:$0xff] %v422_v59  ;;  %v441_v34 = vsel %vm313_vm13, 1, %v913_v6  ;;  %vm316_vm0 = vcmp.gt.f32.partialorder %v188_v29, 0.5  ;;  %v191_v35 = vld [vmem:[%s1015_s24 + $0x198] sm:$0xff]  ;;  %v442_v36 = vsel %vm314_vm14, 1, %v913_v6  ;;  %vm317_vm1 = vcmp.gt.f32.partialorder %v189_v31, 0.5 }
  0x47   : > { %551 = vst [vmem:[%s1032_s17 + $0xd8] sm:$0xff] %v423_v61  ;;  %v192_v37 = vld [vmem:[%s1015_s24 + $0x1a0] sm:$0xff]  ;;  %v443_v38 = vsel %vm315_vm15, 1, %v913_v6  ;;  %vm318_vm2 = vcmp.gt.f32.partialorder %v190_v33, 0.5  ;;  %v193_v39 = vld [vmem:[%s1015_s24 + $0x1a8] sm:$0xff]  ;;  %v444_v40 = vsel %vm316_vm0, 1, %v913_v6 }
  0x48   : > { %552 = vst [vmem:[%s1032_s17 + $0xe0] sm:$0xff] %v424_v63  ;;  %vm319_vm3 = vcmp.gt.f32.partialorder %v191_v35, 0.5  ;;  %v194_v41 = vld [vmem:[%s1015_s24 + $0x1b0] sm:$0xff]  ;;  %v445_v42 = vsel %vm317_vm1, 1, %v913_v6  ;;  %vm320_vm4 = vcmp.gt.f32.partialorder %v192_v37, 0.5  ;;  %v195_v43 = vld [vmem:[%s1015_s24 + $0x1b8] sm:$0xff] }
  0x49   : > { %553 = vst [vmem:[%s1032_s17 + $0xe8] sm:$0xff] %v425_v1  ;;  %v446_v44 = vsel %vm318_vm2, 1, %v913_v6  ;;  %vm321_vm5 = vcmp.gt.f32.partialorder %v193_v39, 0.5  ;;  %v196_v45 = vld [vmem:[%s1015_s24 + $0x1c0] sm:$0xff]  ;;  %v447_v46 = vsel %vm319_vm3, 1, %v913_v6  ;;  %vm322_vm6 = vcmp.gt.f32.partialorder %v194_v41, 0.5 }
  0x4a   : > { %554 = vst [vmem:[%s1032_s17 + $0xf0] sm:$0xff] %v426_v3  ;;  %v197_v47 = vld [vmem:[%s1015_s24 + $0x1c8] sm:$0xff]  ;;  %v448_v48 = vsel %vm320_vm4, 1, %v913_v6  ;;  %vm323_vm7 = vcmp.gt.f32.partialorder %v195_v43, 0.5  ;;  %v198_v49 = vld [vmem:[%s1015_s24 + $0x1d0] sm:$0xff]  ;;  %v449_v50 = vsel %vm321_vm5, 1, %v913_v6 }
  0x4b   : > { %555 = vst [vmem:[%s1032_s17 + $0xf8] sm:$0xff] %v427_v5  ;;  %vm324_vm8 = vcmp.gt.f32.partialorder %v196_v45, 0.5  ;;  %v199_v51 = vld [vmem:[%s1015_s24 + $0x1d8] sm:$0xff]  ;;  %v450_v52 = vsel %vm322_vm6, 1, %v913_v6  ;;  %vm325_vm9 = vcmp.gt.f32.partialorder %v197_v47, 0.5  ;;  %v200_v53 = vld [vmem:[%s1015_s24 + $0x1e0] sm:$0xff] }
  0x4c   : > { %556 = vst [vmem:[%s1032_s17 + $0x100] sm:$0xff] %v428_v8  ;;  %v451_v54 = vsel %vm323_vm7, 1, %v913_v6  ;;  %vm326_vm10 = vcmp.gt.f32.partialorder %v198_v49, 0.5  ;;  %v201_v55 = vld [vmem:[%s1015_s24 + $0x1e8] sm:$0xff]  ;;  %v452_v56 = vsel %vm324_vm8, 1, %v913_v6  ;;  %vm327_vm11 = vcmp.gt.f32.partialorder %v199_v51, 0.5 }
  0x4d   : > { %557 = vst [vmem:[%s1032_s17 + $0x108] sm:$0xff] %v429_v10  ;;  %v202_v57 = vld [vmem:[%s1015_s24 + $0x1f0] sm:$0xff]  ;;  %v453_v58 = vsel %vm325_vm9, 1, %v913_v6  ;;  %vm328_vm12 = vcmp.gt.f32.partialorder %v200_v53, 0.5  ;;  %v203_v59 = vld [vmem:[%s1015_s24 + $0x1f8] sm:$0xff]  ;;  %v454_v60 = vsel %vm326_vm10, 1, %v913_v6 }
  0x4e   : > { %558 = vst [vmem:[%s1032_s17 + $0x110] sm:$0xff] %v430_v12  ;;  %vm329_vm13 = vcmp.gt.f32.partialorder %v201_v55, 0.5  ;;  %v204_v61 = vld [vmem:[%s1015_s24 + $0x200] sm:$0xff]  ;;  %v455_v62 = vsel %vm327_vm11, 1, %v913_v6  ;;  %vm330_vm14 = vcmp.gt.f32.partialorder %v202_v57, 0.5  ;;  %v205_v63 = vld [vmem:[%s1015_s24 + $0x208] sm:$0xff] }
  0x4f   : > { %559 = vst [vmem:[%s1032_s17 + $0x118] sm:$0xff] %v431_v14  ;;  %v456_v0 = vsel %vm328_vm12, 1, %v913_v6  ;;  %vm331_vm15 = vcmp.gt.f32.partialorder %v203_v59, 0.5  ;;  %v206_v1 = vld [vmem:[%s1015_s24 + $0x210] sm:$0xff]  ;;  %v457_v2 = vsel %vm329_vm13, 1, %v913_v6  ;;  %vm332_vm0 = vcmp.gt.f32.partialorder %v204_v61, 0.5 }
  0x50   : > { %560 = vst [vmem:[%s1032_s17 + $0x120] sm:$0xff] %v432_v16  ;;  %v207_v3 = vld [vmem:[%s1015_s24 + $0x218] sm:$0xff]  ;;  %v458_v4 = vsel %vm330_vm14, 1, %v913_v6  ;;  %vm333_vm1 = vcmp.gt.f32.partialorder %v205_v63, 0.5  ;;  %v208_v5 = vld [vmem:[%s1015_s24 + $0x220] sm:$0xff]  ;;  %v459_v7 = vsel %vm331_vm15, 1, %v913_v6 }
  0x51   : > { %561 = vst [vmem:[%s1032_s17 + $0x128] sm:$0xff] %v433_v18  ;;  %vm334_vm2 = vcmp.gt.f32.partialorder %v206_v1, 0.5  ;;  %v209_v8 = vld [vmem:[%s1015_s24 + $0x228] sm:$0xff]  ;;  %v460_v9 = vsel %vm332_vm0, 1, %v913_v6  ;;  %vm335_vm3 = vcmp.gt.f32.partialorder %v207_v3, 0.5  ;;  %v210_v10 = vld [vmem:[%s1015_s24 + $0x230] sm:$0xff] }
  0x52   : > { %562 = vst [vmem:[%s1032_s17 + $0x130] sm:$0xff] %v434_v20  ;;  %v461_v11 = vsel %vm333_vm1, 1, %v913_v6  ;;  %vm336_vm4 = vcmp.gt.f32.partialorder %v208_v5, 0.5  ;;  %v211_v12 = vld [vmem:[%s1015_s24 + $0x238] sm:$0xff]  ;;  %v462_v13 = vsel %vm334_vm2, 1, %v913_v6  ;;  %vm337_vm5 = vcmp.gt.f32.partialorder %v209_v8, 0.5 }
  0x53   : > { %563 = vst [vmem:[%s1032_s17 + $0x138] sm:$0xff] %v435_v22  ;;  %v212_v14 = vld [vmem:[%s1015_s24 + $0x240] sm:$0xff]  ;;  %v463_v15 = vsel %vm335_vm3, 1, %v913_v6  ;;  %vm338_vm6 = vcmp.gt.f32.partialorder %v210_v10, 0.5  ;;  %v213_v16 = vld [vmem:[%s1015_s24 + $0x248] sm:$0xff]  ;;  %v464_v17 = vsel %vm336_vm4, 1, %v913_v6 }
  0x54   : > { %564 = vst [vmem:[%s1032_s17 + $0x140] sm:$0xff] %v436_v24  ;;  %vm339_vm7 = vcmp.gt.f32.partialorder %v211_v12, 0.5  ;;  %v214_v18 = vld [vmem:[%s1015_s24 + $0x250] sm:$0xff]  ;;  %v465_v19 = vsel %vm337_vm5, 1, %v913_v6  ;;  %vm340_vm8 = vcmp.gt.f32.partialorder %v212_v14, 0.5  ;;  %v215_v20 = vld [vmem:[%s1015_s24 + $0x258] sm:$0xff] }
  0x55   : > { %565 = vst [vmem:[%s1032_s17 + $0x148] sm:$0xff] %v437_v26  ;;  %v466_v21 = vsel %vm338_vm6, 1, %v913_v6  ;;  %vm341_vm9 = vcmp.gt.f32.partialorder %v213_v16, 0.5  ;;  %v216_v22 = vld [vmem:[%s1015_s24 + $0x260] sm:$0xff]  ;;  %v467_v23 = vsel %vm339_vm7, 1, %v913_v6  ;;  %vm342_vm10 = vcmp.gt.f32.partialorder %v214_v18, 0.5 }
  0x56   : > { %566 = vst [vmem:[%s1032_s17 + $0x150] sm:$0xff] %v438_v28  ;;  %v217_v24 = vld [vmem:[%s1015_s24 + $0x268] sm:$0xff]  ;;  %v468_v25 = vsel %vm340_vm8, 1, %v913_v6  ;;  %vm343_vm11 = vcmp.gt.f32.partialorder %v215_v20, 0.5  ;;  %v218_v26 = vld [vmem:[%s1015_s24 + $0x270] sm:$0xff]  ;;  %v469_v27 = vsel %vm341_vm9, 1, %v913_v6 }
  0x57   : > { %567 = vst [vmem:[%s1032_s17 + $0x158] sm:$0xff] %v439_v30  ;;  %vm344_vm12 = vcmp.gt.f32.partialorder %v216_v22, 0.5  ;;  %v219_v28 = vld [vmem:[%s1015_s24 + $0x278] sm:$0xff]  ;;  %v470_v29 = vsel %vm342_vm10, 1, %v913_v6  ;;  %vm345_vm13 = vcmp.gt.f32.partialorder %v217_v24, 0.5  ;;  %v220_v30 = vld [vmem:[%s1015_s24 + $0x280] sm:$0xff] }
  0x58   : > { %568 = vst [vmem:[%s1032_s17 + $0x160] sm:$0xff] %v440_v32  ;;  %v471_v31 = vsel %vm343_vm11, 1, %v913_v6  ;;  %vm346_vm14 = vcmp.gt.f32.partialorder %v218_v26, 0.5  ;;  %v221_v32 = vld [vmem:[%s1015_s24 + $0x288] sm:$0xff]  ;;  %v472_v33 = vsel %vm344_vm12, 1, %v913_v6  ;;  %vm347_vm15 = vcmp.gt.f32.partialorder %v219_v28, 0.5 }
  0x59   : > { %569 = vst [vmem:[%s1032_s17 + $0x168] sm:$0xff] %v441_v34  ;;  %v222_v34 = vld [vmem:[%s1015_s24 + $0x290] sm:$0xff]  ;;  %v473_v35 = vsel %vm345_vm13, 1, %v913_v6  ;;  %vm348_vm0 = vcmp.gt.f32.partialorder %v220_v30, 0.5  ;;  %v474_v37 = vsel %vm346_vm14, 1, %v913_v6  ;;  %vm349_vm1 = vcmp.gt.f32.partialorder %v221_v32, 0.5 }
  0x5a   : > { %570 = vst [vmem:[%s1032_s17 + $0x170] sm:$0xff] %v442_v36  ;;  %v223_v36 = vld [vmem:[%s1015_s24 + $0x298] sm:$0xff]  ;;  %v475_v39 = vsel %vm347_vm15, 1, %v913_v6  ;;  %vm350_vm2 = vcmp.gt.f32.partialorder %v222_v34, 0.5  ;;  %v476_v41 = vsel %vm348_vm0, 1, %v913_v6  ;;  %v477_v43 = vsel %vm349_vm1, 1, %v913_v6 }
  0x5b   : > { %571 = vst [vmem:[%s1032_s17 + $0x178] sm:$0xff] %v443_v38  ;;  %v224_v38 = vld [vmem:[%s1015_s24 + $0x2a0] sm:$0xff]  ;;  %vm351_vm3 = vcmp.gt.f32.partialorder %v223_v36, 0.5  ;;  %v478_v45 = vsel %vm350_vm2, 1, %v913_v6  ;;  %s668_s29 = sshll.u32 %s665_s27, 4  ;;  %s653_s30 = scalar_lea.sflag [#allocation4], %s1011_s21  ;;  %s669_s29 = int_to_ptr.hbm [resolvable:$true] %s668_s29 }
  0x5c   : > { %572 = vst [vmem:[%s1032_s17 + $0x180] sm:$0xff] %v444_v40  ;;  %v225_v40 = vld [vmem:[%s1015_s24 + $0x2a8] sm:$0xff]  ;;  %vm352_vm4 = vcmp.gt.f32.partialorder %v224_v38, 0.5  ;;  %v479_v47 = vsel %vm351_vm3, 1, %v913_v6  ;;  %s857_s2 = sshra.s32 %s669_s29, 4  ;;  %s863_s11 = scalar_lea.hbm %s1441_s1, 8192  ;;  %s858_s2 = int_to_ptr.hbm [resolvable:$true] %s857_s2 }
  0x5d   : > { %573 = vst [vmem:[%s1032_s17 + $0x188] sm:$0xff] %v445_v42  ;;  %v226_v42 = vld [vmem:[%s1015_s24 + $0x2b0] sm:$0xff]  ;;  %vm353_vm5 = vcmp.gt.f32.partialorder %v225_v40, 0.5  ;;  %v480_v49 = vsel %vm352_vm4, 1, %v913_v6  ;;  %s859_s3 = scalar_lea.hbm %s858_s2, 1024  ;;  %p864_p0 = scmp.lt.s32.totalorder %s858_s2, %s1441_s1 }
  0x5e   : > { %574 = vst [vmem:[%s1032_s17 + $0x190] sm:$0xff] %v446_v44  ;;  %v227_v44 = vld [vmem:[%s1015_s24 + $0x2b8] sm:$0xff]  ;;  %vm354_vm6 = vcmp.gt.f32.partialorder %v226_v42, 0.5  ;;  %v481_v51 = vsel %vm353_vm5, 1, %v913_v6  ;;  %p860_p6 = scmp.ne.s32.totalorder %s858_s2, %s859_s3  ;;  %p865_p2 = scmp.lt.s32.totalorder %s863_s11, %s859_s3 }
  0x5f   : > { %575 = vst [vmem:[%s1032_s17 + $0x198] sm:$0xff] %v447_v46  ;;  %v228_v46 = vld [vmem:[%s1015_s24 + $0x2c0] sm:$0xff]  ;;  %vm355_vm7 = vcmp.gt.f32.partialorder %v227_v44, 0.5  ;;  %v482_v53 = vsel %vm354_vm6, 1, %v913_v6 }
  0x60   : > { %576 = vst [vmem:[%s1032_s17 + $0x1a0] sm:$0xff] %v448_v48  ;;  %v229_v48 = vld [vmem:[%s1015_s24 + $0x2c8] sm:$0xff]  ;;  %vm356_vm8 = vcmp.gt.f32.partialorder %v228_v46, 0.5  ;;  %v483_v55 = vsel %vm355_vm7, 1, %v913_v6  ;;  %p861_p12 = pnand %p860_p6, %p975_p10  ;;  %p866_p3 = por %p865_p2, %p864_p0 }
  0x61   : > { %577 = vst [vmem:[%s1032_s17 + $0x1a8] sm:$0xff] %v449_v50  ;;  %v230_v50 = vld [vmem:[%s1015_s24 + $0x2d0] sm:$0xff]  ;;  %vm357_vm9 = vcmp.gt.f32.partialorder %v229_v48, 0.5  ;;  %v484_v57 = vsel %vm356_vm8, 1, %v913_v6 }
  0x62   : > { %578 = vst [vmem:[%s1032_s17 + $0x1b0] sm:$0xff] %v450_v52  ;;  %v231_v52 = vld [vmem:[%s1015_s24 + $0x2d8] sm:$0xff]  ;;  %vm358_vm10 = vcmp.gt.f32.partialorder %v230_v50, 0.5  ;;  %v485_v59 = vsel %vm357_vm9, 1, %v913_v6  ;;  %p862_p13 = pneg %p861_p12 }
  0x63   : > { %579 = vst [vmem:[%s1032_s17 + $0x1b8] sm:$0xff] %v451_v54  ;;  %v232_v54 = vld [vmem:[%s1015_s24 + $0x2e0] sm:$0xff]  ;;  %vm359_vm11 = vcmp.gt.f32.partialorder %v231_v52, 0.5  ;;  %v486_v61 = vsel %vm358_vm10, 1, %v913_v6 }
  0x64   : > { %580 = vst [vmem:[%s1032_s17 + $0x1c0] sm:$0xff] %v452_v56  ;;  %v233_v56 = vld [vmem:[%s1015_s24 + $0x2e8] sm:$0xff]  ;;  %vm360_vm12 = vcmp.gt.f32.partialorder %v232_v54, 0.5  ;;  %v487_v63 = vsel %vm359_vm11, 1, %v913_v6  ;;  %p867_p4 = pnand %p866_p3, %p862_p13 }
  0x65   : > { %581 = vst [vmem:[%s1032_s17 + $0x1c8] sm:$0xff] %v453_v58  ;;  %v234_v58 = vld [vmem:[%s1015_s24 + $0x2f0] sm:$0xff]  ;;  %vm361_vm13 = vcmp.gt.f32.partialorder %v233_v56, 0.5  ;;  %v488_v1 = vsel %vm360_vm12, 1, %v913_v6 }
  0x66   : > { %582 = vst [vmem:[%s1032_s17 + $0x1d0] sm:$0xff] %v454_v60  ;;  %v235_v60 = vld [vmem:[%s1015_s24 + $0x2f8] sm:$0xff]  ;;  %vm362_vm14 = vcmp.gt.f32.partialorder %v234_v58, 0.5  ;;  %v489_v3 = vsel %vm361_vm13, 1, %v913_v6 }
  0x67   : > { %583 = vst [vmem:[%s1032_s17 + $0x1d8] sm:$0xff] %v455_v62  ;;  %v236_v62 = vld [vmem:[%s1015_s24 + $0x300] sm:$0xff]  ;;  %vm363_vm15 = vcmp.gt.f32.partialorder %v235_v60, 0.5  ;;  %v490_v5 = vsel %vm362_vm14, 1, %v913_v6 }
  0x68   : > { %584 = vst [vmem:[%s1032_s17 + $0x1e0] sm:$0xff] %v456_v0  ;;  %v237_v0 = vld [vmem:[%s1015_s24 + $0x308] sm:$0xff]  ;;  %vm364_vm0 = vcmp.gt.f32.partialorder %v236_v62, 0.5  ;;  %v491_v8 = vsel %vm363_vm15, 1, %v913_v6 }
  0x69   : > { %585 = vst [vmem:[%s1032_s17 + $0x1e8] sm:$0xff] %v457_v2  ;;  %v238_v2 = vld [vmem:[%s1015_s24 + $0x310] sm:$0xff]  ;;  %vm365_vm1 = vcmp.gt.f32.partialorder %v237_v0, 0.5  ;;  %v492_v10 = vsel %vm364_vm0, 1, %v913_v6 }
  0x6a   : > { %586 = vst [vmem:[%s1032_s17 + $0x1f0] sm:$0xff] %v458_v4  ;;  %v239_v4 = vld [vmem:[%s1015_s24 + $0x318] sm:$0xff]  ;;  %vm366_vm2 = vcmp.gt.f32.partialorder %v238_v2, 0.5  ;;  %v493_v12 = vsel %vm365_vm1, 1, %v913_v6 }
  0x6b   : > { %587 = vst [vmem:[%s1032_s17 + $0x1f8] sm:$0xff] %v459_v7  ;;  %v240_v7 = vld [vmem:[%s1015_s24 + $0x320] sm:$0xff]  ;;  %vm367_vm3 = vcmp.gt.f32.partialorder %v239_v4, 0.5  ;;  %v494_v14 = vsel %vm366_vm2, 1, %v913_v6 }
  0x6c   : > { %588 = vst [vmem:[%s1032_s17 + $0x200] sm:$0xff] %v460_v9  ;;  %v241_v9 = vld [vmem:[%s1015_s24 + $0x328] sm:$0xff]  ;;  %vm368_vm4 = vcmp.gt.f32.partialorder %v240_v7, 0.5  ;;  %v495_v16 = vsel %vm367_vm3, 1, %v913_v6 }
  0x6d   : > { %589 = vst [vmem:[%s1032_s17 + $0x208] sm:$0xff] %v461_v11  ;;  %v242_v11 = vld [vmem:[%s1015_s24 + $0x330] sm:$0xff]  ;;  %vm369_vm5 = vcmp.gt.f32.partialorder %v241_v9, 0.5  ;;  %v496_v18 = vsel %vm368_vm4, 1, %v913_v6 }
  0x6e   : > { %590 = vst [vmem:[%s1032_s17 + $0x210] sm:$0xff] %v462_v13  ;;  %v243_v13 = vld [vmem:[%s1015_s24 + $0x338] sm:$0xff]  ;;  %vm370_vm6 = vcmp.gt.f32.partialorder %v242_v11, 0.5  ;;  %v497_v20 = vsel %vm369_vm5, 1, %v913_v6 }
  0x6f   : > { %591 = vst [vmem:[%s1032_s17 + $0x218] sm:$0xff] %v463_v15  ;;  %v244_v15 = vld [vmem:[%s1015_s24 + $0x340] sm:$0xff]  ;;  %vm371_vm7 = vcmp.gt.f32.partialorder %v243_v13, 0.5  ;;  %v498_v22 = vsel %vm370_vm6, 1, %v913_v6 }
  0x70   : > { %592 = vst [vmem:[%s1032_s17 + $0x220] sm:$0xff] %v464_v17  ;;  %v245_v17 = vld [vmem:[%s1015_s24 + $0x348] sm:$0xff]  ;;  %vm372_vm8 = vcmp.gt.f32.partialorder %v244_v15, 0.5  ;;  %v499_v24 = vsel %vm371_vm7, 1, %v913_v6 }
  0x71   : > { %593 = vst [vmem:[%s1032_s17 + $0x228] sm:$0xff] %v465_v19  ;;  %v246_v19 = vld [vmem:[%s1015_s24 + $0x350] sm:$0xff]  ;;  %vm373_vm9 = vcmp.gt.f32.partialorder %v245_v17, 0.5  ;;  %v500_v26 = vsel %vm372_vm8, 1, %v913_v6 }
  0x72   : > { %594 = vst [vmem:[%s1032_s17 + $0x230] sm:$0xff] %v466_v21  ;;  %v247_v21 = vld [vmem:[%s1015_s24 + $0x358] sm:$0xff]  ;;  %vm374_vm10 = vcmp.gt.f32.partialorder %v246_v19, 0.5  ;;  %v501_v28 = vsel %vm373_vm9, 1, %v913_v6 }
  0x73   : > { %595 = vst [vmem:[%s1032_s17 + $0x238] sm:$0xff] %v467_v23  ;;  %v248_v23 = vld [vmem:[%s1015_s24 + $0x360] sm:$0xff]  ;;  %vm375_vm11 = vcmp.gt.f32.partialorder %v247_v21, 0.5  ;;  %v502_v30 = vsel %vm374_vm10, 1, %v913_v6 }
  0x74   : > { %596 = vst [vmem:[%s1032_s17 + $0x240] sm:$0xff] %v468_v25  ;;  %v249_v25 = vld [vmem:[%s1015_s24 + $0x368] sm:$0xff]  ;;  %vm376_vm12 = vcmp.gt.f32.partialorder %v248_v23, 0.5  ;;  %v503_v32 = vsel %vm375_vm11, 1, %v913_v6 }
  0x75   : > { %597 = vst [vmem:[%s1032_s17 + $0x248] sm:$0xff] %v469_v27  ;;  %v250_v27 = vld [vmem:[%s1015_s24 + $0x370] sm:$0xff]  ;;  %vm377_vm13 = vcmp.gt.f32.partialorder %v249_v25, 0.5  ;;  %v504_v34 = vsel %vm376_vm12, 1, %v913_v6 }
  0x76   : > { %598 = vst [vmem:[%s1032_s17 + $0x250] sm:$0xff] %v470_v29  ;;  %v251_v29 = vld [vmem:[%s1015_s24 + $0x378] sm:$0xff]  ;;  %vm378_vm14 = vcmp.gt.f32.partialorder %v250_v27, 0.5  ;;  %v505_v36 = vsel %vm377_vm13, 1, %v913_v6 }
  0x77   : > { %599 = vst [vmem:[%s1032_s17 + $0x258] sm:$0xff] %v471_v31  ;;  %v252_v31 = vld [vmem:[%s1015_s24 + $0x380] sm:$0xff]  ;;  %vm379_vm15 = vcmp.gt.f32.partialorder %v251_v29, 0.5  ;;  %v506_v38 = vsel %vm378_vm14, 1, %v913_v6 }
  0x78   : > { %600 = vst [vmem:[%s1032_s17 + $0x260] sm:$0xff] %v472_v33  ;;  %v253_v33 = vld [vmem:[%s1015_s24 + $0x388] sm:$0xff]  ;;  %vm380_vm0 = vcmp.gt.f32.partialorder %v252_v31, 0.5  ;;  %v507_v40 = vsel %vm379_vm15, 1, %v913_v6 }
  0x79   : > { %601 = vst [vmem:[%s1032_s17 + $0x268] sm:$0xff] %v473_v35  ;;  %v254_v35 = vld [vmem:[%s1015_s24 + $0x390] sm:$0xff]  ;;  %vm381_vm1 = vcmp.gt.f32.partialorder %v253_v33, 0.5  ;;  %v508_v42 = vsel %vm380_vm0, 1, %v913_v6 }
  0x7a   : > { %602 = vst [vmem:[%s1032_s17 + $0x270] sm:$0xff] %v474_v37  ;;  %v255_v37 = vld [vmem:[%s1015_s24 + $0x398] sm:$0xff]  ;;  %vm382_vm2 = vcmp.gt.f32.partialorder %v254_v35, 0.5  ;;  %v509_v44 = vsel %vm381_vm1, 1, %v913_v6 }
  0x7b   : > { %603 = vst [vmem:[%s1032_s17 + $0x278] sm:$0xff] %v475_v39  ;;  %v256_v39 = vld [vmem:[%s1015_s24 + $0x3a0] sm:$0xff]  ;;  %vm383_vm3 = vcmp.gt.f32.partialorder %v255_v37, 0.5  ;;  %v510_v46 = vsel %vm382_vm2, 1, %v913_v6 }
  0x7c   : > { %604 = vst [vmem:[%s1032_s17 + $0x280] sm:$0xff] %v476_v41  ;;  %v257_v41 = vld [vmem:[%s1015_s24 + $0x3a8] sm:$0xff]  ;;  %vm384_vm4 = vcmp.gt.f32.partialorder %v256_v39, 0.5  ;;  %v511_v48 = vsel %vm383_vm3, 1, %v913_v6 }
  0x7d   : > { %605 = vst [vmem:[%s1032_s17 + $0x288] sm:$0xff] %v477_v43  ;;  %v258_v43 = vld [vmem:[%s1015_s24 + $0x3b0] sm:$0xff]  ;;  %vm385_vm5 = vcmp.gt.f32.partialorder %v257_v41, 0.5  ;;  %v512_v50 = vsel %vm384_vm4, 1, %v913_v6 }
  0x7e   : > { %606 = vst [vmem:[%s1032_s17 + $0x290] sm:$0xff] %v478_v45  ;;  %v259_v45 = vld [vmem:[%s1015_s24 + $0x3b8] sm:$0xff]  ;;  %vm386_vm6 = vcmp.gt.f32.partialorder %v258_v43, 0.5  ;;  %v513_v52 = vsel %vm385_vm5, 1, %v913_v6 }
  0x7f   : > { %607 = vst [vmem:[%s1032_s17 + $0x298] sm:$0xff] %v479_v47  ;;  %v260_v47 = vld [vmem:[%s1015_s24 + $0x3c0] sm:$0xff]  ;;  %vm387_vm7 = vcmp.gt.f32.partialorder %v259_v45, 0.5  ;;  %v514_v54 = vsel %vm386_vm6, 1, %v913_v6 }
  0x80   : > { %608 = vst [vmem:[%s1032_s17 + $0x2a0] sm:$0xff] %v480_v49  ;;  %v261_v49 = vld [vmem:[%s1015_s24 + $0x3c8] sm:$0xff]  ;;  %vm388_vm8 = vcmp.gt.f32.partialorder %v260_v47, 0.5  ;;  %v515_v56 = vsel %vm387_vm7, 1, %v913_v6 }
  0x81   : > { %609 = vst [vmem:[%s1032_s17 + $0x2a8] sm:$0xff] %v481_v51  ;;  %v262_v51 = vld [vmem:[%s1015_s24 + $0x3d0] sm:$0xff]  ;;  %vm389_vm9 = vcmp.gt.f32.partialorder %v261_v49, 0.5  ;;  %v516_v58 = vsel %vm388_vm8, 1, %v913_v6 }
  0x82   : > { %610 = vst [vmem:[%s1032_s17 + $0x2b0] sm:$0xff] %v482_v53  ;;  %v263_v53 = vld [vmem:[%s1015_s24 + $0x3d8] sm:$0xff]  ;;  %vm390_vm10 = vcmp.gt.f32.partialorder %v262_v51, 0.5  ;;  %v517_v60 = vsel %vm389_vm9, 1, %v913_v6 }
  0x83   : > { %611 = vst [vmem:[%s1032_s17 + $0x2b8] sm:$0xff] %v483_v55  ;;  %v264_v55 = vld [vmem:[%s1015_s24 + $0x3e0] sm:$0xff]  ;;  %vm391_vm11 = vcmp.gt.f32.partialorder %v263_v53, 0.5  ;;  %v518_v62 = vsel %vm390_vm10, 1, %v913_v6 }
  0x84   : > { %612 = vst [vmem:[%s1032_s17 + $0x2c0] sm:$0xff] %v484_v57  ;;  %v265_v57 = vld [vmem:[%s1015_s24 + $0x3e8] sm:$0xff]  ;;  %vm392_vm12 = vcmp.gt.f32.partialorder %v264_v55, 0.5 }
  0x85   : > { %613 = vst [vmem:[%s1032_s17 + $0x2c8] sm:$0xff] %v485_v59  ;;  %v266_v59 = vld [vmem:[%s1015_s24 + $0x3f0] sm:$0xff]  ;;  %vm393_vm13 = vcmp.gt.f32.partialorder %v265_v57, 0.5  ;;  %v520_v0 = vsel %vm392_vm12, 1, %v913_v6 }
  0x86   : > { %614 = vst [vmem:[%s1032_s17 + $0x2d0] sm:$0xff] %v486_v61  ;;  %v267_v61 = vld [vmem:[%s1015_s24 + $0x3f8] sm:$0xff]  ;;  %vm394_vm14 = vcmp.gt.f32.partialorder %v266_v59, 0.5 }
  0x87   : > { %615 = vst [vmem:[%s1032_s17 + $0x2d8] sm:$0xff] %v487_v63  ;;  %v519_v63 = vsel %vm391_vm11, 1, %v913_v6  ;;  %vm395_vm15 = vcmp.gt.f32.partialorder %v267_v61, 0.5  ;;  %v522_v2 = vsel %vm394_vm14, 1, %v913_v6 }
  0x88   : > { %616 = vst [vmem:[%s1032_s17 + $0x2e0] sm:$0xff] %v488_v1  ;;  %v521_v1 = vsel %vm393_vm13, 1, %v913_v6 }
  0x89   : > { %617 = vst [vmem:[%s1032_s17 + $0x2e8] sm:$0xff] %v489_v3  ;;  %v523_v3 = vsel %vm395_vm15, 1, %v913_v6 }
  0x8a   : > { %618 = vst [vmem:[%s1032_s17 + $0x2f0] sm:$0xff] %v490_v5 }
  0x8b   : > { %619 = vst [vmem:[%s1032_s17 + $0x2f8] sm:$0xff] %v491_v8 }
  0x8c   : > { %620 = vst [vmem:[%s1032_s17 + $0x300] sm:$0xff] %v492_v10 }
  0x8d   : > { %621 = vst [vmem:[%s1032_s17 + $0x308] sm:$0xff] %v493_v12 }
  0x8e   : > { %622 = vst [vmem:[%s1032_s17 + $0x310] sm:$0xff] %v494_v14 }
  0x8f   : > { %623 = vst [vmem:[%s1032_s17 + $0x318] sm:$0xff] %v495_v16 }
  0x90   : > { %624 = vst [vmem:[%s1032_s17 + $0x320] sm:$0xff] %v496_v18 }
  0x91   : > { %625 = vst [vmem:[%s1032_s17 + $0x328] sm:$0xff] %v497_v20 }
  0x92   : > { %626 = vst [vmem:[%s1032_s17 + $0x330] sm:$0xff] %v498_v22 }
  0x93   : > { %627 = vst [vmem:[%s1032_s17 + $0x338] sm:$0xff] %v499_v24 }
  0x94   : > { %628 = vst [vmem:[%s1032_s17 + $0x340] sm:$0xff] %v500_v26 }
  0x95   : > { %629 = vst [vmem:[%s1032_s17 + $0x348] sm:$0xff] %v501_v28 }
  0x96   : > { %630 = vst [vmem:[%s1032_s17 + $0x350] sm:$0xff] %v502_v30 }
  0x97   : > { %631 = vst [vmem:[%s1032_s17 + $0x358] sm:$0xff] %v503_v32 }
  0x98   : > { %632 = vst [vmem:[%s1032_s17 + $0x360] sm:$0xff] %v504_v34 }
  0x99   : > { %633 = vst [vmem:[%s1032_s17 + $0x368] sm:$0xff] %v505_v36 }
  0x9a   : > { %634 = vst [vmem:[%s1032_s17 + $0x370] sm:$0xff] %v506_v38 }
  0x9b   : > { %635 = vst [vmem:[%s1032_s17 + $0x378] sm:$0xff] %v507_v40 }
  0x9c   : > { %636 = vst [vmem:[%s1032_s17 + $0x380] sm:$0xff] %v508_v42 }
  0x9d   : > { %637 = vst [vmem:[%s1032_s17 + $0x388] sm:$0xff] %v509_v44 }
  0x9e   : > { %638 = vst [vmem:[%s1032_s17 + $0x390] sm:$0xff] %v510_v46 }
  0x9f   : > { %639 = vst [vmem:[%s1032_s17 + $0x398] sm:$0xff] %v511_v48 }
  0xa0   : > { %640 = vst [vmem:[%s1032_s17 + $0x3a0] sm:$0xff] %v512_v50 }
  0xa1   : > { %641 = vst [vmem:[%s1032_s17 + $0x3a8] sm:$0xff] %v513_v52 }
  0xa2   : > { %642 = vst [vmem:[%s1032_s17 + $0x3b0] sm:$0xff] %v514_v54 }
  0xa3   : > { %643 = vst [vmem:[%s1032_s17 + $0x3b8] sm:$0xff] %v515_v56 }
  0xa4   : > { %644 = vst [vmem:[%s1032_s17 + $0x3c0] sm:$0xff] %v516_v58 }
  0xa5   : > { %645 = vst [vmem:[%s1032_s17 + $0x3c8] sm:$0xff] %v517_v60 }
  0xa6   : > { %646 = vst [vmem:[%s1032_s17 + $0x3d0] sm:$0xff] %v518_v62 }
  0xa7   : > { %647 = vst [vmem:[%s1032_s17 + $0x3d8] sm:$0xff] %v519_v63 }
  0xa8   : > { %648 = vst [vmem:[%s1032_s17 + $0x3e0] sm:$0xff] %v520_v0 }
  0xa9   : > { %649 = vst [vmem:[%s1032_s17 + $0x3e8] sm:$0xff] %v521_v1 }
  0xaa   : > { %650 = vst [vmem:[%s1032_s17 + $0x3f0] sm:$0xff] %v522_v2 }
  0xab   : > { %651 = vst [vmem:[%s1032_s17 + $0x3f8] sm:$0xff] %v523_v3 }
  0xac   : > { %870 = shalt.err (!%p867_p4)
}
  0xad   : > { %s914_s16 = smov 4096   ;;  %s915_s20 = smov 256  }
  0xae   : > { %764 = dma.vmem_to_hbm [thread:$0]  (%p975_p10), %s667_s28, 16384, %s669_s29, %s653_s30, %s914_s16, %s914_s16, %s915_s20  }
  0xaf PF: > { %p775_p5 = scmp.ge.s32.totalorder %s909_s9, 2  ;;  %s683_s21 = sand.u32 1, %s897_s6  }
  0xb0   : > { %s684_s22 = scalar_lea.sflag [#allocation4], %s683_s21 }
  0xb1   : > { %p771_p7 = pnand %p775_p5, %p979_p11 }
  0xb3   : > { %p772_p8 = pneg %p771_p7 }
  0xb5   : > { %892 = dma.done.wait (%p772_p8), %s684_s22, 16384  }
  0xb6   : > { %894 = vsyncadd (%p772_p8), %s684_s22, 4294950912  ;;  %p14_p9 = scmp.ge.s32.totalorder %s951_s12, 10   ;;  %s1447_s6 = smov %s901_s7 }
  0xb7   : > { %s1448_s7 = smov %s905_s8  ;;  %s1449_s8 = smov %s963_s15 }
  0xb8   : > { %s1450_s9 = smov %s951_s12  ;;  %16 = sbr.rel (!%p14_p9) target bundleno = 5 (0x5), region = 69 }
  0xbd   :  { %690 = vsyncpa [#allocation3], 1 }
  0xbe   :  { %692 = vsyncpa [#allocation3 + $0x1], 1 }
  0xbf   :  { %693 = vsyncpa [#allocation4], 1 }
  0xc0   :  { %695 = vsyncpa [#allocation4 + $0x1], 1 }

</bundles_post_ra>
